<compile_context>
chip_gen: v5e
topology: v5e:2x2
jax: 0.10.0
libtpu: 0.0.40
codegen_flags: <defaults>
</compile_context>

<pallas_src>
import numpy as np

import jax
import jax.numpy as jnp
from jax.experimental import pallas as pl
from jax.experimental.pallas import tpu as pltpu

LEAKY_SLOPE = 0.01  # F.leaky_relu default negative_slope

# Static network geometry (from the PyTorch module).
IN_H, IN_W = 6, 7                 # board
H1, W1_, C1 = 4, 5, 28            # after conv1
H2, W2_, C2 = 2, 3, 16            # after conv2
P0 = IN_H * IN_W                  # 42  input pixels  (C_in = 1)
P1 = H1 * W1_ * C1                # 560 conv1 activations (NHWC flat)
P2 = H2 * W2_ * C2                # 96  conv2 activations (NHWC flat)
OUT = 7


# ---------------------------------------------------------------------------
# Fused Pallas kernel: the whole forward pass for one batch tile.
# ---------------------------------------------------------------------------
def _convnet_fused_kernel(x_ref, w1_ref, b1_ref, w2_ref, b2_ref,
                          wf_ref, bf_ref, o_ref):
    x = x_ref[...]                                                    # (tb, 42)

    # conv1 + leaky_relu  (im2col is baked into w1_ref -> one MXU matmul)
    y1 = jnp.dot(x, w1_ref[...], preferred_element_type=jnp.float32)
    y1 = y1 + b1_ref[...]                                             # (tb, 560)
    y1 = jnp.where(y1 > 0, y1, LEAKY_SLOPE * y1)

    # conv2 + leaky_relu
    y2 = jnp.dot(y1, w2_ref[...], preferred_element_type=jnp.float32)
    y2 = y2 + b2_ref[...]                                             # (tb, 96)
    y2 = jnp.where(y2 > 0, y2, LEAKY_SLOPE * y2)

    # fc (wf_ref is pre-permuted to the NHWC flatten order of y2)
    out = jnp.dot(y2, wf_ref[...], preferred_element_type=jnp.float32)
    out = out + bf_ref[...]                                           # (tb, 7)
    o_ref[...] = out.astype(o_ref.dtype)


# ---------------------------------------------------------------------------
# One-time parameter prep (host / XLA, outside the hot path).
# Bakes im2col + all layout permutations into dense weight matrices.
# ---------------------------------------------------------------------------
def _conv_scatter(in_h, in_w, kh, kw):
    """0/1 indicator S[p_in, p_out, i, j]: input pixel p_in is tap (i, j) of
    output position p_out for a VALID, stride-1 conv."""
    out_h, out_w = in_h - kh + 1, in_w - kw + 1
    s = np.zeros((in_h * in_w, out_h * out_w, kh, kw), np.float32)
    for q in range(out_h):
        for r in range(out_w):
            for i in range(kh):
                for j in range(kw):
                    s[(q + i) * in_w + (r + j), q * out_w + r, i, j] = 1.0
    return s


def prep_params(params):
    """PyTorch-layout params -> kernel-ready matrices (run once)."""
    w1, b1 = params["w1"], params["b1"]        # (28,1,3,3), (28,)
    w2, b2 = params["w2"], params["b2"]        # (16,28,3,3), (16,)
    wf, bf = params["wf"], params["bf"]        # (7,96), (7,)

    s1 = jnp.asarray(_conv_scatter(IN_H, IN_W, 3, 3))   # (42, 20, 3, 3)
    s2 = jnp.asarray(_conv_scatter(H1, W1_, 3, 3))      # (20,  6, 3, 3)

    w1_hwio = jnp.transpose(w1, (2, 3, 1, 0))           # (3,3,1,28)
    w2_hwio = jnp.transpose(w2, (2, 3, 1, 0))           # (3,3,28,16)

    # conv1 as dense (42, 560): columns laid out as (h1, w1, c1) NHWC-flat.
    w1_big = jnp.einsum("pqij,ijo->pqo", s1, w1_hwio[:, :, 0, :]).reshape(P0, P1)
    # conv2 as dense (560, 96): rows match y1 layout, cols (h2, w2, c2).
    w2_big = jnp.einsum("pqij,ijco->pcqo", s2, w2_hwio).reshape(P1, P2)
    # fc weight permuted from PyTorch's (C,H,W) flatten to our (H,W,C) flatten.
    wf_hwc = jnp.transpose(wf.reshape(OUT, C2, H2, W2_), (2, 3, 1, 0)).reshape(P2, OUT)

    return {
        "w1": w1_big.astype(jnp.float32),
        "b1": jnp.tile(b1, H1 * W1_).reshape(1, P1).astype(jnp.float32),
        "w2": w2_big.astype(jnp.float32),
        "b2": jnp.tile(b2, H2 * W2_).reshape(1, P2).astype(jnp.float32),
        "wf": wf_hwc.astype(jnp.float32),
        "bf": bf.reshape(1, OUT).astype(jnp.float32),
    }


# ---------------------------------------------------------------------------
# Forward pass: one pallas_call, grid over the batch only.
# ---------------------------------------------------------------------------
def convnet_forward(x_nchw, prepped, *, block_n=256):
    """x_nchw: (N, 1, 6, 7) float32 -> logits (N, 7) float32."""
    n = x_nchw.shape[0]
    x2 = x_nchw.reshape(n, P0).astype(jnp.float32)       # (N, 42); C_in == 1

    tb = min(block_n, n)
    n_pad = ((n + tb - 1) // tb) * tb
    if n_pad != n:
        x2 = jnp.pad(x2, ((0, n_pad - n), (0, 0)))

    w1, b1 = prepped["w1"], prepped["b1"]
    w2, b2 = prepped["w2"], prepped["b2"]
    wf, bf = prepped["wf"], prepped["bf"]

    flops = 2 * n_pad * (P0 * P1 + P1 * P2 + P2 * OUT)
    bytes_accessed = 4 * (x2.size + w1.size + b1.size + w2.size + b2.size
                          + wf.size + bf.size + n_pad * OUT)

    out = pl.pallas_call(
        _convnet_fused_kernel,
        out_shape=jax.ShapeDtypeStruct((n_pad, OUT), jnp.float32),
        grid=(n_pad // tb,),
        in_specs=[
            pl.BlockSpec((tb, P0), lambda i: (i, 0)),     # x tile
            pl.BlockSpec((P0, P1), lambda i: (0, 0)),     # conv1 weight (dense)
            pl.BlockSpec((1, P1), lambda i: (0, 0)),      # conv1 bias
            pl.BlockSpec((P1, P2), lambda i: (0, 0)),     # conv2 weight (dense)
            pl.BlockSpec((1, P2), lambda i: (0, 0)),      # conv2 bias
            pl.BlockSpec((P2, OUT), lambda i: (0, 0)),    # fc weight (permuted)
            pl.BlockSpec((1, OUT), lambda i: (0, 0)),     # fc bias
        ],
        out_specs=pl.BlockSpec((tb, OUT), lambda i: (i, 0)),
        compiler_params=pltpu.CompilerParams(
            dimension_semantics=("parallel",)),
        cost_estimate=pl.CostEstimate(flops=flops, transcendentals=0,
                                      bytes_accessed=bytes_accessed),
    )(x2, w1, b1, w2, b2, wf, bf)

    return out[:n] if n_pad != n else out


# ---------------------------------------------------------------------------
# Deterministic parameter init (PyTorch-style uniform(-1/sqrt(fan_in), +...))
# ---------------------------------------------------------------------------
def init_params(key):
    def uinit(k, shape, fan_in):
        bound = 1.0 / jnp.sqrt(jnp.float32(fan_in))
        return jax.random.uniform(k, shape, jnp.float32, -bound, bound)

    ks = jax.random.split(key, 6)
    return {
        "w1": uinit(ks[0], (28, 1, 3, 3), 1 * 3 * 3),
        "b1": uinit(ks[1], (28,), 1 * 3 * 3),
        "w2": uinit(ks[2], (16, 28, 3, 3), 28 * 3 * 3),
        "b2": uinit(ks[3], (16,), 28 * 3 * 3),
        "wf": uinit(ks[4], (7, 96), 96),
        "bf": uinit(ks[5], (7,), 96),
    }


# ---------------------------------------------------------------------------
# Pure-JAX reference (for correctness check)
# ---------------------------------------------------------------------------
def convnet_reference(x, params):
    dn = ("NCHW", "OIHW", "NCHW")
    y = jax.lax.conv_general_dilated(x, params["w1"], (1, 1), "VALID",
                                     dimension_numbers=dn)
    y = y + params["b1"].reshape(1, 28, 1, 1)
    y = jnp.where(y > 0, y, LEAKY_SLOPE * y)
    y = jax.lax.conv_general_dilated(y, params["w2"], (1, 1), "VALID",
                                     dimension_numbers=dn)
    y = y + params["b2"].reshape(1, 16, 1, 1)
    y = jnp.where(y > 0, y, LEAKY_SLOPE * y)
    y = y.reshape(y.shape[0], -1)
    return y @ params["wf"].T + params["bf"]


if __name__ == "__main__":
    key = jax.random.PRNGKey(0)
    k_x, k_p = jax.random.split(key)

    # Connect-4 board: batch=2, 1 channel, 6x7 grid (NCHW, like PyTorch).
    x = jax.random.normal(k_x, (2, 1, 6, 7), dtype=jnp.float32)
    params = init_params(k_p)

    # One-time parameter prep (im2col baked in, all layout transposes hoisted).
    prepped = prep_params(params)

    fwd = jax.jit(convnet_forward)
    out = jax.block_until_ready(fwd(x, prepped))
    assert out.shape == (2, 7), out.shape

    ref = jax.block_until_ready(convnet_reference(x, params))
    assert jnp.allclose(out, ref, atol=2e-4, rtol=2e-4), \
        f"max abs err {jnp.max(jnp.abs(out - ref))}"

    print("KERNEL_OK")
</pallas_src>

<mosaic_0001>
module attributes {stable_mosaic.version = 11 : i64} {
  func.func @_convnet_fused_kernel(%arg0: i32, %arg1: memref<2x42xf32, #tpu.memory_space<vmem>>, %arg2: memref<42x560xf32, #tpu.memory_space<vmem>>, %arg3: memref<1x560xf32, #tpu.memory_space<vmem>>, %arg4: memref<560x96xf32, #tpu.memory_space<vmem>>, %arg5: memref<1x96xf32, #tpu.memory_space<vmem>>, %arg6: memref<96x7xf32, #tpu.memory_space<vmem>>, %arg7: memref<1x7xf32, #tpu.memory_space<vmem>>, %arg8: memref<2x7xf32, #tpu.memory_space<vmem>>) attributes {dimension_semantics = [#tpu.dimension_semantics<parallel>], iteration_bounds = array<i64: 1>, scalar_prefetch = 0 : i64, scratch_operands = 0 : i64, tpu.core_type = #tpu.core_type<tc>, window_params = [{transform_indices = @transform_0, window_bounds = array<i64: 2, 42>}, {pipeline_mode = #tpu.pipeline_mode<synchronous>, transform_indices = @transform_1, window_bounds = array<i64: 42, 560>}, {pipeline_mode = #tpu.pipeline_mode<synchronous>, transform_indices = @transform_2, window_bounds = array<i64: 1, 560>}, {pipeline_mode = #tpu.pipeline_mode<synchronous>, transform_indices = @transform_3, window_bounds = array<i64: 560, 96>}, {pipeline_mode = #tpu.pipeline_mode<synchronous>, transform_indices = @transform_4, window_bounds = array<i64: 1, 96>}, {pipeline_mode = #tpu.pipeline_mode<synchronous>, transform_indices = @transform_5, window_bounds = array<i64: 96, 7>}, {pipeline_mode = #tpu.pipeline_mode<synchronous>, transform_indices = @transform_6, window_bounds = array<i64: 1, 7>}, {transform_indices = @transform_7, window_bounds = array<i64: 2, 7>}]} {
    %c0 = arith.constant 0 : index
    %c0_0 = arith.constant 0 : index
    %0 = vector.load %arg1[%c0, %c0_0] : memref<2x42xf32, #tpu.memory_space<vmem>>, vector<2x42xf32>
    %c0_1 = arith.constant 0 : index
    %c0_2 = arith.constant 0 : index
    %1 = vector.load %arg2[%c0_1, %c0_2] : memref<42x560xf32, #tpu.memory_space<vmem>>, vector<42x560xf32>
    %cst = arith.constant dense<0.000000e+00> : vector<2x560xf32>
    %2 = tpu.matmul %0, %1, %cst {dimension_numbers = #tpu.dot_dimension_numbers<[1], [0], [0], [1], [0, 0, 1, 1], [], []>} : vector<2x42xf32>, vector<42x560xf32>, vector<2x560xf32> -> vector<2x560xf32>
    %c0_3 = arith.constant 0 : index
    %c0_4 = arith.constant 0 : index
    %3 = vector.load %arg3[%c0_3, %c0_4] : memref<1x560xf32, #tpu.memory_space<vmem>>, vector<1x560xf32>
    %4 = vector.broadcast %3 : vector<1x560xf32> to vector<2x560xf32>
    %5 = arith.addf %2, %4 : vector<2x560xf32>
    %cst_5 = arith.constant 0.000000e+00 : f32
    %6 = vector.broadcast %cst_5 : f32 to vector<2x560xf32>
    %7 = arith.cmpf ogt, %5, %6 : vector<2x560xf32>
    %cst_6 = arith.constant 0.00999999977 : f32
    %8 = vector.broadcast %cst_6 : f32 to vector<2x560xf32>
    %9 = arith.mulf %8, %5 : vector<2x560xf32>
    %10 = arith.select %7, %5, %9 : vector<2x560xi1>, vector<2x560xf32>
    %c0_7 = arith.constant 0 : index
    %c0_8 = arith.constant 0 : index
    %11 = vector.load %arg4[%c0_7, %c0_8] : memref<560x96xf32, #tpu.memory_space<vmem>>, vector<560x96xf32>
    %cst_9 = arith.constant dense<0.000000e+00> : vector<2x96xf32>
    %12 = tpu.matmul %10, %11, %cst_9 {dimension_numbers = #tpu.dot_dimension_numbers<[1], [0], [0], [1], [0, 0, 1, 1], [], []>} : vector<2x560xf32>, vector<560x96xf32>, vector<2x96xf32> -> vector<2x96xf32>
    %c0_10 = arith.constant 0 : index
    %c0_11 = arith.constant 0 : index
    %13 = vector.load %arg5[%c0_10, %c0_11] : memref<1x96xf32, #tpu.memory_space<vmem>>, vector<1x96xf32>
    %14 = vector.broadcast %13 : vector<1x96xf32> to vector<2x96xf32>
    %15 = arith.addf %12, %14 : vector<2x96xf32>
    %cst_12 = arith.constant 0.000000e+00 : f32
    %16 = vector.broadcast %cst_12 : f32 to vector<2x96xf32>
    %17 = arith.cmpf ogt, %15, %16 : vector<2x96xf32>
    %cst_13 = arith.constant 0.00999999977 : f32
    %18 = vector.broadcast %cst_13 : f32 to vector<2x96xf32>
    %19 = arith.mulf %18, %15 : vector<2x96xf32>
    %20 = arith.select %17, %15, %19 : vector<2x96xi1>, vector<2x96xf32>
    %c0_14 = arith.constant 0 : index
    %c0_15 = arith.constant 0 : index
    %21 = vector.load %arg6[%c0_14, %c0_15] : memref<96x7xf32, #tpu.memory_space<vmem>>, vector<96x7xf32>
    %cst_16 = arith.constant dense<0.000000e+00> : vector<2x7xf32>
    %22 = tpu.matmul %20, %21, %cst_16 {dimension_numbers = #tpu.dot_dimension_numbers<[1], [0], [0], [1], [0, 0, 1, 1], [], []>} : vector<2x96xf32>, vector<96x7xf32>, vector<2x7xf32> -> vector<2x7xf32>
    %c0_17 = arith.constant 0 : index
    %c0_18 = arith.constant 0 : index
    %23 = vector.load %arg7[%c0_17, %c0_18] : memref<1x7xf32, #tpu.memory_space<vmem>>, vector<1x7xf32>
    %24 = vector.broadcast %23 : vector<1x7xf32> to vector<2x7xf32>
    %25 = arith.addf %22, %24 : vector<2x7xf32>
    %c0_19 = arith.constant 0 : index
    %c0_20 = arith.constant 0 : index
    %26 = vector.load %arg8[%c0_19, %c0_20] : memref<2x7xf32, #tpu.memory_space<vmem>>, vector<2x7xf32>
    tpu.vector_store %arg8[%c0_19, %c0_20], %25 {strides = array<i32>} : memref<2x7xf32, #tpu.memory_space<vmem>>, vector<2x7xf32>,
    return
  }
  func.func @transform_0(%arg0: i32) -> (i32, i32) {
    %c0_i32 = arith.constant 0 : i32
    %c0_i32_0 = arith.constant 0 : i32
    return %arg0, %c0_i32 : i32, i32
  }
  func.func @transform_1(%arg0: i32) -> (i32, i32) {
    %c0_i32 = arith.constant 0 : i32
    %c0_i32_0 = arith.constant 0 : i32
    %c0_i32_1 = arith.constant 0 : i32
    return %c0_i32, %c0_i32_0 : i32, i32
  }
  func.func @transform_2(%arg0: i32) -> (i32, i32) {
    %c0_i32 = arith.constant 0 : i32
    %c0_i32_0 = arith.constant 0 : i32
    %c0_i32_1 = arith.constant 0 : i32
    return %c0_i32, %c0_i32_0 : i32, i32
  }
  func.func @transform_3(%arg0: i32) -> (i32, i32) {
    %c0_i32 = arith.constant 0 : i32
    %c0_i32_0 = arith.constant 0 : i32
    %c0_i32_1 = arith.constant 0 : i32
    return %c0_i32, %c0_i32_0 : i32, i32
  }
  func.func @transform_4(%arg0: i32) -> (i32, i32) {
    %c0_i32 = arith.constant 0 : i32
    %c0_i32_0 = arith.constant 0 : i32
    %c0_i32_1 = arith.constant 0 : i32
    return %c0_i32, %c0_i32_0 : i32, i32
  }
  func.func @transform_5(%arg0: i32) -> (i32, i32) {
    %c0_i32 = arith.constant 0 : i32
    %c0_i32_0 = arith.constant 0 : i32
    %c0_i32_1 = arith.constant 0 : i32
    return %c0_i32, %c0_i32_0 : i32, i32
  }
  func.func @transform_6(%arg0: i32) -> (i32, i32) {
    %c0_i32 = arith.constant 0 : i32
    %c0_i32_0 = arith.constant 0 : i32
    %c0_i32_1 = arith.constant 0 : i32
    return %c0_i32, %c0_i32_0 : i32, i32
  }
  func.func @transform_7(%arg0: i32) -> (i32, i32) {
    %c0_i32 = arith.constant 0 : i32
    %c0_i32_0 = arith.constant 0 : i32
    return %arg0, %c0_i32 : i32, i32
  }
}

</mosaic_0001>

<bundles_post_ra>
// kernel: convnet_forward.1
= control target key start
LH: loop header
LB: loop body
LE: loop exit
PB: predicated region body
PF: predicated region fallthrough
CT: control target
= control target key end

     0   :  { %vm74_vm0 = vcmask 1041408   ;;  %vm70_vm1 = vcmask 343040   ;;  %s887_s0 = inlined_call_operand.vmem [shape: f32[2,42], index: 0, kind: input, shape index: {}]   ;;  %s888_s1 = inlined_call_operand.vmem [shape: f32[42,560], index: 1, kind: input, shape index: {}]   ;;  %s889_s2 = inlined_call_operand.vmem [shape: f32[1,560], index: 2, kind: input, shape index: {}]   ;;  %s890_s3 = inlined_call_operand.vmem [shape: f32[560,96], index: 3, kind: input, shape index: {}]   ;;  %s891_s4 = inlined_call_operand.vmem [shape: f32[1,96], index: 4, kind: input, shape index: {}]   ;;  %s892_s5 = inlined_call_operand.vmem [shape: f32[96,7], index: 5, kind: input, shape index: {}]   ;;  %s893_s6 = inlined_call_operand.vmem [shape: f32[1,7], index: 6, kind: input, shape index: {}]   ;;  %s894_s7 = inlined_call_operand.hbm [shape: f32[2,7], index: 7, kind: output, shape index: {}]  }
   0x1   :  { %v55_v0 = vld [vmem:[%s888_s1 + $0xd8] sm:$0x3]  ;;  %v50_v1 = vld [vmem:[%s888_s1 + $0xb0] sm:$0xff]  ;;  %v53_v3 = vld [vmem:[%s888_s1 + $0xc8] sm:$0x3] }
   0x2   :  { %448 = vmatpush.msk.msra.mxu3 %vm74_vm0, %v55_v0  ;;  %v54_v2 = vld [vmem:[%s888_s1 + $0xd0] sm:$0x3]  ;;  %v45_v4 = vld [vmem:[%s888_s1 + $0x88] sm:$0xff]  ;;  %444 = vmatpush.msk.msra.mxu0 %vm74_vm0, %v53_v3  ;;  %v48_v6 = vld [vmem:[%s888_s1 + $0xa0] sm:$0xff] }
   0x3   :  { %446 = vmatpush.msk.msra.mxu1 %vm74_vm0, %v54_v2  ;;  %v49_v5 = vld [vmem:[%s888_s1 + $0xa8] sm:$0xff]  ;;  %v44_v7 = vld [vmem:[%s888_s1 + $0x80] sm:$0xff]  ;;  %v43_v8 = vld [vmem:[%s888_s1 + $0x78] sm:$0xff] }
   0x4   :  { %141 = vmatpush.msra.mxu3 %v50_v1  ;;  %v40_v9 = vld [vmem:[%s888_s1 + $0x60] sm:$0xff]  ;;  %101 = vmatpush.msra.mxu0 %v48_v6  ;;  %v39_v10 = vld [vmem:[%s888_s1 + $0x58] sm:$0xff]  ;;  %v38_v11 = vld [vmem:[%s888_s1 + $0x50] sm:$0xff] }
   0x5   :  { %121 = vmatpush.msra.mxu1 %v49_v5  ;;  %v35_v12 = vld [vmem:[%s888_s1 + $0x38] sm:$0xff]  ;;  %v34_v13 = vld [vmem:[%s888_s1 + $0x30] sm:$0xff]  ;;  %v33_v14 = vld [vmem:[%s888_s1 + $0x28] sm:$0xff] }
   0x6   :  { %142 = vmatpush.msra.mxu3 %v45_v4  ;;  %102 = vmatpush.msra.mxu0 %v43_v8  ;;  %v30_v15 = vld [vmem:[%s888_s1 + $0x10] sm:$0xff]  ;;  %v56_v16 = vld [vmem:[%s888_s1 + $0xe0] sm:$0x3]  ;;  %v29_v17 = vld [vmem:[%s888_s1 + $0x8] sm:$0xff] }
   0x7   :  { %122 = vmatpush.msra.mxu1 %v44_v7  ;;  %v27_v18 = vld [vmem:[%s887_s0] sm:$0x3]  ;;  %v236_v20 = vld [vmem:[%s890_s3 + $0xf8] sm:$0xff]  ;;  %v57_v22 = vld [vmem:[%s888_s1 + $0xe8] sm:$0x3] }
   0x8   :  { %143 = vmatpush.msra.mxu3 %v40_v9  ;;  %103 = vmatpush.msra.mxu0 %v38_v11  ;;  %v28_v19 = vld [vmem:[%s888_s1] sm:$0xff]  ;;  %v51_v21 = vld [vmem:[%s888_s1 + $0xb8] sm:$0xff]  ;;  %v46_v24 = vld [vmem:[%s888_s1 + $0x90] sm:$0xff] }
   0x9   :  { %123 = vmatpush.msra.mxu1 %v39_v10  ;;  %303 = vmatpush.msra.mxu2 %v236_v20  ;;  %v220_v23 = vld [vmem:[%s890_s3 + $0x78] sm:$0xff]  ;;  %v52_v25 = vld [vmem:[%s888_s1 + $0xc0] sm:$0xff]  ;;  %v235_v26 = vld [vmem:[%s890_s3 + $0xf0] sm:$0xff] }
   0xa   :  { %144 = vmatpush.msra.mxu3 %v35_v12  ;;  %104 = vmatpush.msra.mxu0 %v33_v14  ;;  %v41_v27 = vld [vmem:[%s888_s1 + $0x68] sm:$0xff]  ;;  %v219_v28 = vld [vmem:[%s890_s3 + $0x70] sm:$0xff]  ;;  %v47_v29 = vld [vmem:[%s888_s1 + $0x98] sm:$0xff] }
   0xb   :  { %124 = vmatpush.msra.mxu1 %v34_v13  ;;  %v234_v30 = vld [vmem:[%s890_s3 + $0xe8] sm:$0xff]  ;;  %v36_v31 = vld [vmem:[%s888_s1 + $0x40] sm:$0xff]  ;;  %304 = vmatpush.msra.mxu2 %v235_v26  ;;  %v42_v33 = vld [vmem:[%s888_s1 + $0x70] sm:$0xff] }
   0xc   :  { %145 = vmatpush.msra.mxu3 %v30_v15  ;;  %105 = vmatpush.msra.mxu0 %v28_v19  ;;  %v218_v32 = vld [vmem:[%s890_s3 + $0x68] sm:$0xff]  ;;  %v233_v34 = vld [vmem:[%s890_s3 + $0xe0] sm:$0xff]  ;;  %v31_v35 = vld [vmem:[%s888_s1 + $0x18] sm:$0xff] }
   0xd   :  { %125 = vmatpush.msra.mxu1 %v29_v17  ;;  %449 = vmatmul.msk.f32.vlgmr.msra.gmra.mxu3 %vm70_vm1, %v27_v18  ;;  %v217_v36 = vld [vmem:[%s890_s3 + $0x60] sm:$0xff]  ;;  %v37_v37 = vld [vmem:[%s888_s1 + $0x48] sm:$0xff]  ;;  %v252_v38 = vld [vmem:[%s890_s3 + $0x178] sm:$0xff] }
   0xe   :  { %450 = vmatpush.msk.msrb.mxu3 %vm74_vm0, %v56_v16  ;;  %447 = vmatmul.msk.f32.vlgmr.msra.gmra.mxu1 %vm70_vm1, %v27_v18  ;;  %v232_v39 = vld [vmem:[%s890_s3 + $0xd8] sm:$0xff]  ;;  %v32_v40 = vld [vmem:[%s888_s1 + $0x20] sm:$0xff]  ;;  %v251_v42 = vld [vmem:[%s890_s3 + $0x170] sm:$0xff] }
   0xf   :  { %452 = vmatpush.msk.msrb.mxu0 %vm74_vm0, %v57_v22  ;;  %283 = vmatpush.msrb.mxu1 %v220_v23  ;;  %v216_v41 = vld [vmem:[%s890_s3 + $0x58] sm:$0xff]  ;;  %v250_v43 = vld [vmem:[%s890_s3 + $0x168] sm:$0xff]  ;;  %v231_v44 = vld [vmem:[%s890_s3 + $0xd0] sm:$0xff] }
  0x10   :  { %161 = vmatpush.msrb.mxu3 %v51_v21  ;;  %445 = vmatmul.msk.f32.vlgmr.msra.gmra.mxu0 %vm70_vm1, %v27_v18  ;;  %v215_v45 = vld [vmem:[%s890_s3 + $0x50] sm:$0xff]  ;;  %v268_v46 = vld [vmem:[%s890_s3 + $0x1f8] sm:$0xff]  ;;  %v230_v47 = vld [vmem:[%s890_s3 + $0xc8] sm:$0xff] }
  0x11   :  { %181 = vmatpush.msrb.mxu0 %v52_v25  ;;  %284 = vmatpush.msrb.mxu1 %v219_v28  ;;  %v214_v48 = vld [vmem:[%s890_s3 + $0x48] sm:$0xff] }
  0x12   :  { %162 = vmatpush.msrb.mxu3 %v46_v24  ;;  %305 = vmatpush.msra.mxu2 %v234_v30 }
  0x13   :  { %182 = vmatpush.msrb.mxu0 %v47_v29  ;;  %285 = vmatpush.msrb.mxu1 %v218_v32 }
  0x14   :  { %163 = vmatpush.msrb.mxu3 %v41_v27  ;;  %306 = vmatpush.msra.mxu2 %v233_v34 }
  0x15   :  { %183 = vmatpush.msrb.mxu0 %v42_v33  ;;  %286 = vmatpush.msrb.mxu1 %v217_v36 }
  0x16   :  { %164 = vmatpush.msrb.mxu3 %v36_v31  ;;  %307 = vmatpush.msra.mxu2 %v232_v39 }
  0x17   :  { %184 = vmatpush.msrb.mxu0 %v37_v37  ;;  %287 = vmatpush.msrb.mxu1 %v216_v41 }
  0x18   :  { %165 = vmatpush.msrb.mxu3 %v31_v35 }
  0x19   :  { %451 = vmatmul.msk.f32.vlgmr.msrb.gmra.mxu3 %vm70_vm1, %v27_v18  ;;  %185 = vmatpush.msrb.mxu0 %v32_v40 }
  0x1a   :  { %323 = vmatpush.msra.mxu3 %v252_v38  ;;  %453 = vmatmul.msk.f32.vlgmr.msrb.gmra.mxu0 %vm70_vm1, %v27_v18 }
  0x1c   :  { %324 = vmatpush.msra.mxu3 %v251_v42 }
  0x1d   :  { %12 = vsyncpa [#allocation3], 0  ;;  %v249_v49 = vld [vmem:[%s890_s3 + $0x160] sm:$0xff]  ;;  %308 = vmatpush.msra.mxu2 %v231_v44  ;;  %288 = vmatpush.msrb.mxu1 %v215_v45  ;;  %v267_v50 = vld [vmem:[%s890_s3 + $0x1f0] sm:$0xff]  ;;  %vm279_vm6 = vcmask 392192   ;;  %vm402_vm9 = vcmask 785408  }
  0x1e   :  { %325 = vmatpush.msra.mxu3 %v250_v43  ;;  %343 = vmatpush.msra.mxu0 %v268_v46  ;;  %v229_v51 = vld [vmem:[%s890_s3 + $0xc0] sm:$0xff]  ;;  %v248_v53 = vld [vmem:[%s890_s3 + $0x158] sm:$0xff]  ;;  %v266_v54 = vld [vmem:[%s890_s3 + $0x1e8] sm:$0xff]  ;;  %s435_s12 = sshll.u32 %s894_s7, 4  ;;  %vm426_vm10 = vcmask 50176   ;;  %s436_s12 = int_to_ptr.hbm [resolvable:$true] %s435_s12 }
  0x1f   :  { %v213_v52 = vld [vmem:[%s890_s3 + $0x40] sm:$0xff]  ;;  %309 = vmatpush.msra.mxu2 %v230_v47  ;;  %289 = vmatpush.msrb.mxu1 %v214_v48  ;;  %v228_v55 = vld [vmem:[%s890_s3 + $0xb8] sm:$0xff]  ;;  %v247_v57 = vld [vmem:[%s890_s3 + $0x150] sm:$0xff] }
  0x20   :  { %326 = vmatpush.msra.mxu3 %v249_v49  ;;  %344 = vmatpush.msra.mxu0 %v267_v50  ;;  %v212_v56 = vld [vmem:[%s890_s3 + $0x38] sm:$0xff]  ;;  %v265_v58 = vld [vmem:[%s890_s3 + $0x1e0] sm:$0xff]  ;;  %v227_v59 = vld [vmem:[%s890_s3 + $0xb0] sm:$0xff] }
  0x21   :  { %310 = vmatpush.msra.mxu2 %v229_v51  ;;  %290 = vmatpush.msrb.mxu1 %v213_v52  ;;  %v211_v60 = vld [vmem:[%s890_s3 + $0x30] sm:$0xff]  ;;  %v246_v61 = vld [vmem:[%s890_s3 + $0x148] sm:$0xff]  ;;  %v264_v62 = vld [vmem:[%s890_s3 + $0x1d8] sm:$0xff] }
  0x22   :  { %327 = vmatpush.msra.mxu3 %v248_v53  ;;  %345 = vmatpush.msra.mxu0 %v266_v54  ;;  %v226_v63 = vld [vmem:[%s890_s3 + $0xa8] sm:$0xff]  ;;  %v245_v1 = vld [vmem:[%s890_s3 + $0x140] sm:$0xff]  ;;  %v263_v2 = vld [vmem:[%s890_s3 + $0x1d0] sm:$0xff] }
  0x23   :  { %311 = vmatpush.msra.mxu2 %v228_v55  ;;  %291 = vmatpush.msrb.mxu1 %v212_v56  ;;  %v210_v0 = vld [vmem:[%s890_s3 + $0x28] sm:$0xff]  ;;  %v225_v3 = vld [vmem:[%s890_s3 + $0xa0] sm:$0xff]  ;;  %v244_v5 = vld [vmem:[%s890_s3 + $0x138] sm:$0xff] }
  0x24   :  { %328 = vmatpush.msra.mxu3 %v247_v57  ;;  %346 = vmatpush.msra.mxu0 %v265_v58  ;;  %v209_v4 = vld [vmem:[%s890_s3 + $0x20] sm:$0xff]  ;;  %v262_v6 = vld [vmem:[%s890_s3 + $0x1c8] sm:$0xff]  ;;  %v224_v7 = vld [vmem:[%s890_s3 + $0x98] sm:$0xff] }
  0x25   :  { %312 = vmatpush.msra.mxu2 %v227_v59  ;;  %292 = vmatpush.msrb.mxu1 %v211_v60  ;;  %v243_v8 = vld [vmem:[%s890_s3 + $0x130] sm:$0xff]  ;;  %v242_v9 = vld [vmem:[%s890_s3 + $0x128] sm:$0xff]  ;;  %v241_v10 = vld [vmem:[%s890_s3 + $0x120] sm:$0xff] }
  0x26   :  { %329 = vmatpush.msra.mxu3 %v246_v61  ;;  %347 = vmatpush.msra.mxu0 %v264_v62  ;;  %v208_v11 = vld [vmem:[%s890_s3 + $0x18] sm:$0xff]  ;;  %v223_v12 = vld [vmem:[%s890_s3 + $0x90] sm:$0xff]  ;;  %v261_v14 = vld [vmem:[%s890_s3 + $0x1c0] sm:$0xff] }
  0x27   :  { %313 = vmatpush.msra.mxu2 %v226_v63  ;;  %293 = vmatpush.msrb.mxu1 %v210_v0  ;;  %v240_v13 = vld [vmem:[%s890_s3 + $0x118] sm:$0xff]  ;;  %v207_v15 = vld [vmem:[%s890_s3 + $0x10] sm:$0xff]  ;;  %v222_v16 = vld [vmem:[%s890_s3 + $0x88] sm:$0xff] }
  0x28   :  { %330 = vmatpush.msra.mxu3 %v245_v1  ;;  %348 = vmatpush.msra.mxu0 %v263_v2  ;;  %v239_v17 = vld [vmem:[%s890_s3 + $0x110] sm:$0xff]  ;;  %v260_v18 = vld [vmem:[%s890_s3 + $0x1b8] sm:$0xff]  ;;  %v206_v19 = vld [vmem:[%s890_s3 + $0x8] sm:$0xff] }
  0x29   :  { %314 = vmatpush.msra.mxu2 %v225_v3  ;;  %294 = vmatpush.msrb.mxu1 %v209_v4  ;;  %v221_v20 = vld [vmem:[%s890_s3 + $0x80] sm:$0xff]  ;;  %v238_v21 = vld [vmem:[%s890_s3 + $0x108] sm:$0xff]  ;;  %v259_v22 = vld [vmem:[%s890_s3 + $0x1b0] sm:$0xff] }
  0x2a   :  { %331 = vmatpush.msra.mxu3 %v244_v5  ;;  %349 = vmatpush.msra.mxu0 %v262_v6  ;;  %v205_v23 = vld [vmem:[%s890_s3] sm:$0xff]  ;;  %v258_v25 = vld [vmem:[%s890_s3 + $0x1a8] sm:$0xff]  ;;  %v256_v29 = vld [vmem:[%s890_s3 + $0x198] sm:$0xff] }
  0x2b   :  { %315 = vmatpush.msra.mxu2 %v224_v7  ;;  %295 = vmatpush.msrb.mxu1 %v208_v11  ;;  %v237_v24 = vld [vmem:[%s890_s3 + $0x100] sm:$0xff]  ;;  %v274_v26 = vld [vmem:[%s890_s3 + $0x228] sm:$0xff]  ;;  %v272_v30 = vld [vmem:[%s890_s3 + $0x218] sm:$0xff] }
  0x2c   :  { %332 = vmatpush.msra.mxu3 %v243_v8  ;;  %350 = vmatpush.msra.mxu0 %v261_v14  ;;  %v257_v27 = vld [vmem:[%s890_s3 + $0x1a0] sm:$0xff]  ;;  %v255_v31 = vld [vmem:[%s890_s3 + $0x190] sm:$0xff]  ;;  %v254_v33 = vld [vmem:[%s890_s3 + $0x188] sm:$0xff] }
  0x2d   :  { %316 = vmatpush.msra.mxu2 %v223_v12  ;;  %296 = vmatpush.msrb.mxu1 %v207_v15  ;;  %v273_v28 = vld [vmem:[%s890_s3 + $0x220] sm:$0xff]  ;;  %v271_v32 = vld [vmem:[%s890_s3 + $0x210] sm:$0xff]  ;;  %v270_v34 = vld [vmem:[%s890_s3 + $0x208] sm:$0xff] }
  0x2e   :  { %333 = vmatpush.msra.mxu3 %v242_v9  ;;  %351 = vmatpush.msra.mxu0 %v260_v18  ;;  %v253_v35 = vld [vmem:[%s890_s3 + $0x180] sm:$0xff]  ;;  %v397_v37 = vld [vmem:[%s892_s5 + $0x58] sm:$0xff]  ;;  %v396_v38 = vld [vmem:[%s892_s5 + $0x50] sm:$0xff] }
  0x2f   :  { %317 = vmatpush.msra.mxu2 %v222_v16  ;;  %297 = vmatpush.msrb.mxu1 %v206_v19  ;;  %v269_v36 = vld [vmem:[%s890_s3 + $0x200] sm:$0xff]  ;;  %v395_v39 = vld [vmem:[%s892_s5 + $0x48] sm:$0xff]  ;;  %v393_v3 = vld [vmem:[%s892_s5 + $0x38] sm:$0xff] }
  0x30   :  { %334 = vmatpush.msra.mxu3 %v241_v10  ;;  %352 = vmatpush.msra.mxu0 %v259_v22  ;;  %v394_v40 = vld [vmem:[%s892_s5 + $0x40] sm:$0xff]  ;;  %v392_v4 = vld [vmem:[%s892_s5 + $0x30] sm:$0xff]  ;;  %v391_v5 = vld [vmem:[%s892_s5 + $0x28] sm:$0xff] }
  0x31   :  { %318 = vmatpush.msra.mxu2 %v221_v20  ;;  %298 = vmatpush.msrb.mxu1 %v205_v23  ;;  %v58_v41 = vld [vmem:[%s889_s2] sm:$0x1f]  ;;  %v389_v7 = vld [vmem:[%s892_s5 + $0x18] sm:$0xff]  ;;  %v388_v8 = vld [vmem:[%s892_s5 + $0x10] sm:$0xff] }
  0x32   :  { %335 = vmatpush.msra.mxu3 %v240_v13  ;;  %353 = vmatpush.msra.mxu0 %v258_v25  ;;  %v61_v42 = vperm.slane %v58_v41, 1  ;;  %v60_v43 = vperm.slane %v58_v41, 0  ;;  %v62_v46 = vperm.slane %v58_v41, 2  ;;  %v64_v56 = vperm.slane %v58_v41, 4  ;;  %v390_v6 = vld [vmem:[%s892_s5 + $0x20] sm:$0xff]  ;;  %v387_v9 = vld [vmem:[%s892_s5 + $0x8] sm:$0xff] }
  0x33   :  { %373 = vmatpush.msra.mxu1 %v274_v26  ;;  %410 = vmatpush.msrb.mxu2 %v397_v37  ;;  %v63_v58 = vperm.slane %v58_v41, 3  ;;  %v386_v10 = vld [vmem:[%s892_s5] sm:$0xff] }
  0x34   :  { %336 = vmatpush.msra.mxu3 %v239_v17  ;;  %354 = vmatpush.msra.mxu0 %v257_v27  ;;  %v457_v11 = vld [vmem:[%s891_s4] ss:$0 sm:$0xff]  ;;  %s485_s4 = smov [#allocation2]  }
  0x35   :  { %374 = vmatpush.msra.mxu1 %v273_v28  ;;  %411 = vmatpush.msrb.mxu2 %v396_v38  ;;  %s433_s9 = sshll.u32 %s485_s4, 4  ;;  %s434_s9 = int_to_ptr.vmem [resolvable:$true] %s433_s9 }
  0x36   :  { %337 = vmatpush.msra.mxu3 %v238_v21  ;;  %355 = vmatpush.msra.mxu0 %v256_v29 }
  0x37   :  { %375 = vmatpush.msra.mxu1 %v272_v30  ;;  %412 = vmatpush.msrb.mxu2 %v395_v39 }
  0x38   :  { %338 = vmatpush.msra.mxu3 %v237_v24  ;;  %356 = vmatpush.msra.mxu0 %v255_v31  ;;  %v458_v24 = vld [vmem:[%s893_s6] ss:$0 sm:$0xff] }
  0x39   :  { %376 = vmatpush.msra.mxu1 %v271_v32  ;;  %413 = vmatpush.msrb.mxu2 %v394_v40 }
  0x3a   :  { %357 = vmatpush.msra.mxu0 %v254_v33 }
  0x3b   :  { %377 = vmatpush.msra.mxu1 %v270_v34  ;;  %414 = vmatpush.msrb.mxu2 %v393_v3 }
  0x3c   :  { %358 = vmatpush.msra.mxu0 %v253_v35 }
  0x3d   :  { %378 = vmatpush.msra.mxu1 %v269_v36  ;;  %415 = vmatpush.msrb.mxu2 %v392_v4 }
  0x3f   :  { %416 = vmatpush.msrb.mxu2 %v391_v5 }
  0x41   :  { %417 = vmatpush.msrb.mxu2 %v390_v6 }
  0x43   :  { %418 = vmatpush.msrb.mxu2 %v389_v7 }
  0x45   :  { %419 = vmatpush.msrb.mxu2 %v388_v8 }
  0x47   :  { %420 = vmatpush.msrb.mxu2 %v387_v9 }
  0x49   :  { %421 = vmatpush.msrb.mxu2 %v386_v10 }
  0x8b   :  { %v127_v44 = vpop.f32.mrf.mxu1 }
  0x8c   :  { %v128_v45 = vadd.f32 %v127_v44, %v61_v42 }
  0x8d   :  { %v107_v47 = vpop.f32.mrf.mxu0 }
  0x8e   :  { %v108_v48 = vadd.f32 %v107_v47, %v60_v43  ;;  %vm191_vm2 = vcmp.gt.f32.partialorder %v128_v45, 0.0  ;;  %v196_v49 = vmul.f32 0.01, %v128_v45 }
  0x90   :  { %v147_v50 = vpop.f32.mrf.mxu3  ;;  %v195_v51 = vmul.f32 0.01, %v108_v48  ;;  %v201_v52 = vsel %vm191_vm2, %v128_v45, %v196_v49  ;;  %vm190_vm3 = vcmp.gt.f32.partialorder %v108_v48, 0.0 }
  0x91   :  { %v148_v53 = vadd.f32 %v147_v50, %v62_v46  ;;  %319 = vmatmul.f32.vlgmr.msra.gmra.mxu2 %v201_v52 }
  0x92   :  { %v200_v54 = vsel %vm190_vm3, %v108_v48, %v195_v51 }
  0x93   :  { %vm192_vm4 = vcmp.gt.f32.partialorder %v148_v53, 0.0  ;;  %v197_v55 = vmul.f32 0.01, %v148_v53  ;;  %299 = vmatmul.f32.vlgmr.msrb.gmra.mxu1 %v200_v54 }
  0x95   :  { %v202_v57 = vsel %vm192_vm4, %v148_v53, %v197_v55 }
  0x96   :  { %339 = vmatmul.f32.vlgmr.msra.gmra.mxu3 %v202_v57 }
  0x97   :  { %v187_v59 = vpop.f32.mrf.mxu0 }
  0x98   :  { %v188_v60 = vadd.f32 %v187_v59, %v64_v56 }
  0x9a   :  { %vm194_vm5 = vcmp.gt.f32.partialorder %v188_v60, 0.0  ;;  %v199_v62 = vmul.f32 0.01, %v188_v60 }
  0x9c   :  { %v167_v61 = vpop.f32.mrf.mxu3  ;;  %v204_v0 = vsel %vm194_vm5, %v188_v60, %v199_v62 }
  0x9d   :  { %v168_v63 = vadd.f32 %v167_v61, %v63_v58  ;;  %454 = vmatmul.msk.f32.vlgmr.msra.gmra.mxu1 %vm279_vm6, %v204_v0 }
  0x9f   :  { %vm193_vm7 = vcmp.gt.f32.partialorder %v168_v63, 0.0  ;;  %v198_v1 = vmul.f32 0.01, %v168_v63 }
  0xa1   :  { %v203_v2 = vsel %vm193_vm7, %v168_v63, %v198_v1 }
  0xa2   :  { %359 = vmatmul.f32.vlgmr.msra.gmra.mxu0 %v203_v2 }
 0x110   :  { %v300_v12 = vpop.f32.mrf.mxu1 }
 0x111   :  { %v301_v13 = vadd.f32 %v457_v11, %v300_v12 }
 0x114   :  { %v320_v14 = vpop.f32.mrf.mxu2 }
 0x115   :  { %v321_v15 = vadd.f32 %v320_v14, %v301_v13 }
 0x119   :  { %v340_v16 = vpop.f32.mrf.mxu3 }
 0x11a   :  { %v341_v17 = vadd.f32 %v340_v16, %v321_v15  ;;  %v380_v20 = vpop.f32.mrf.mxu1 }
 0x11f   :  { %v360_v18 = vpop.f32.mrf.mxu0 }
 0x120   :  { %v361_v19 = vadd.f32 %v360_v18, %v341_v17 }
 0x122   :  { %v381_v21 = vadd.f32 %v380_v20, %v361_v19 }
 0x124   :  { %vm383_vm8 = vcmp.gt.f32.partialorder %v381_v21, 0.0  ;;  %v384_v22 = vmul.f32 0.01, %v381_v21 }
 0x126   :  { %v385_v23 = vsel %vm383_vm8, %v381_v21, %v384_v22 }
 0x127   :  { %455 = vmatmul.msk.f32.vlgmr.msrb.gmra.mxu2 %vm402_vm9, %v385_v23 }
 0x1aa   :  { %v423_v25 = vpop.f32.mrf.mxu2 }
 0x1ab   :  { %v424_v26 = vadd.f32 %v458_v24, %v423_v25 }
 0x1ad   :  { %427 = vst.msk [vmem:[#allocation2] sm:$0x3] %vm426_vm10, %v424_v26 }
 0x1ae   :  { %438 = dma.vmem_to_hbm [thread:$0]  %s434_s9, 32, %s436_s12, [#allocation3]  }
 0x1af   :  { %483 = dma.done.wait [#allocation3], 32  }
 0x1b0   :  { %484 = vsyncadd [#allocation3], 4294967264 }
 0x1b1   :  { %443 = vsyncpa [#allocation3], 1 }

</bundles_post_ra>
